<compile_context>
chip_gen: v7x
topology: tpu7x:2x2x1
jax: 0.10.0
libtpu: 0.0.40
codegen_flags: <defaults>
</compile_context>

<pallas_src>
import functools

import jax
import jax.numpy as jnp
from jax.experimental import pallas as pl
from jax.experimental.pallas import tpu as pltpu


def _round_up(a, b):
    return (a + b - 1) // b * b


def _cdiv(a, b):
    return (a + b - 1) // b


# --------------------------------------------------------------------------
# Kernels
# --------------------------------------------------------------------------

def _proj_kernel_single_k(x_ref, w_ref, b_ref, o_ref):
    """Whole-K GEMM step: out = x @ W + bias.  No accumulator scratch."""
    acc = jnp.dot(x_ref[...], w_ref[...], preferred_element_type=jnp.float32)
    o_ref[...] = (acc + b_ref[...]).astype(o_ref.dtype)


def _proj_kernel_multi_k(x_ref, w_ref, b_ref, o_ref, acc_ref):
    """K-tiled GEMM step with f32 VMEM accumulator (only used for K > 2048)."""
    k = pl.program_id(1)

    @pl.when(k == 0)
    def _():
        acc_ref[...] = jnp.zeros_like(acc_ref)

    acc_ref[...] += jnp.dot(x_ref[...], w_ref[...],
                            preferred_element_type=jnp.float32)

    @pl.when(k == pl.num_programs(1) - 1)
    def _():
        o_ref[...] = (acc_ref[...] + b_ref[...]).astype(o_ref.dtype)


# --------------------------------------------------------------------------
# Tiling helpers
# --------------------------------------------------------------------------

def _choose_tile_m(M, tile_m, sub):
    """Sublane-aligned M tile; prefers a divisor of M (no pad pass) and keeps
    at least two M tiles so the 'parallel' axis feeds both TCs on v7x."""
    tile_m = max(sub, tile_m - tile_m % sub)
    if M <= tile_m:
        if M > sub:                      # split so megacore has >= 2 tiles
            return _round_up(_cdiv(M, 2), sub)
        return _round_up(M, sub)
    if M % sub == 0:
        t = tile_m
        lo = max(sub, tile_m // 4)
        while t >= lo:
            if M % t == 0:               # divisor of M -> no M padding needed
                return t
            t -= sub
    return tile_m


# --------------------------------------------------------------------------
# Forward
# --------------------------------------------------------------------------

def patch_embed_forward(x, weight, bias, patch_size, *, flatten=True,
                        compute_dtype=None, out_dtype=None, tile_m=1024):
    """PatchEmbed forward.

    x:      (B, C, H, W)   NCHW, like the PyTorch module
    weight: (D, C, ph, pw) conv weight (PyTorch layout)
    bias:   (D,)
    compute_dtype: matmul operand dtype; defaults to bf16 when x is float32
                   (f32 accumulation either way).
    out_dtype: output dtype; defaults to x.dtype.
    returns (B, N, D) if flatten else (B, D, gh, gw)
    """
    B, C, H, W = x.shape
    D = weight.shape[0]
    ph, pw = patch_size
    if H % ph != 0 or W % pw != 0:
        raise ValueError(
            f"Input image size ({H}x{W}) not divisible by patch size ({ph}x{pw}).")
    gh, gw = H // ph, W // pw
    N = gh * gw
    K = C * ph * pw
    M = B * N

    if out_dtype is None:
        out_dtype = x.dtype
    if compute_dtype is None:
        # bf16 operands + f32 accumulation is the MXU fast path on all three gens.
        compute_dtype = jnp.bfloat16 if x.dtype == jnp.float32 else x.dtype
    in_it = jnp.dtype(compute_dtype).itemsize
    out_it = jnp.dtype(out_dtype).itemsize

    # --- patch extraction: one fused XLA transpose+cast pass (see TODO above) ---
    # (B, C, gh, ph, gw, pw) -> (B, gh, gw, C, ph, pw) -> (M, K)
    patches = x.reshape(B, C, gh, ph, gw, pw)
    patches = jnp.transpose(patches, (0, 2, 4, 1, 3, 5)).reshape(M, K)
    patches = patches.astype(compute_dtype)
    # Conv weight (D, C, ph, pw) -> (K, D) dense projection matrix (tiny).
    w2d = weight.reshape(D, K).T.astype(compute_dtype)

    # --- tile selection ---
    d_pad = _round_up(D, 128)                     # lane-dense output width
    sub = 16 if in_it == 2 else 8                 # sublane multiple
    tm = _choose_tile_m(M, tile_m, sub)
    m_pad = _round_up(M, tm)

    if K <= 2048:
        # Whole K in one block: no accumulator, and no K padding at all
        # (the block spans the full K dim, which Pallas allows unaligned).
        tk, k_pad, k_tiles = K, K, 1
    else:
        k_lane = _round_up(K, 128)
        tk = _round_up(_cdiv(k_lane, _cdiv(k_lane, 2048)), 128)
        k_pad = _round_up(k_lane, tk)
        k_tiles = k_pad // tk

    def _vmem_bytes(tm_):
        kb = _round_up(tk, 128)
        b = (2 * tm_ * kb * in_it              # x tile, double-buffered
             + 2 * kb * d_pad * in_it          # W tile
             + 2 * tm_ * d_pad * out_it        # out tile
             + 2 * d_pad * 4)                  # bias
        if k_tiles > 1:
            b += tm_ * d_pad * 4               # f32 accumulator
        return b

    VMEM_CAP = 48 * 1024 * 1024                # leaves headroom on v7x (64 MiB)
    while _vmem_bytes(tm) > VMEM_CAP - (4 << 20) and tm > sub:
        tm = max(sub, _round_up(tm // 2, sub))
        m_pad = _round_up(M, tm)

    # --- pad only when actually needed (typical ViT shapes need none) ---
    if m_pad != M or k_pad != K:
        patches = jnp.pad(patches, ((0, m_pad - M), (0, k_pad - K)))
    if k_pad != K or d_pad != D:
        w2d = jnp.pad(w2d, ((0, k_pad - K), (0, d_pad - D)))
    b2d = bias.astype(jnp.float32)
    if d_pad != D:
        b2d = jnp.pad(b2d, (0, d_pad - D))
    b2d = b2d.reshape(1, d_pad)

    vmem_limit = int(min(VMEM_CAP, max(32 * 1024 * 1024,
                                       _vmem_bytes(tm) + (4 << 20))))

    cost = pl.CostEstimate(
        flops=2 * m_pad * k_pad * d_pad,
        transcendentals=0,
        bytes_accessed=(m_pad * k_pad + k_pad * d_pad) * in_it
                       + m_pad * d_pad * out_it)

    if k_tiles == 1:
        kernel = _proj_kernel_single_k
        grid_spec = pltpu.PrefetchScalarGridSpec(
            num_scalar_prefetch=0,
            grid=(m_pad // tm,),
            in_specs=[
                pl.BlockSpec((tm, tk), lambda i: (i, 0)),       # patches tile
                pl.BlockSpec((tk, d_pad), lambda i: (0, 0)),    # W (resident)
                pl.BlockSpec((1, d_pad), lambda i: (0, 0)),     # bias (resident)
            ],
            out_specs=pl.BlockSpec((tm, d_pad), lambda i: (i, 0)),
        )
        dims = ("parallel",)
    else:
        kernel = _proj_kernel_multi_k
        grid_spec = pltpu.PrefetchScalarGridSpec(
            num_scalar_prefetch=0,
            grid=(m_pad // tm, k_tiles),
            in_specs=[
                pl.BlockSpec((tm, tk), lambda i, k: (i, k)),
                pl.BlockSpec((tk, d_pad), lambda i, k: (k, 0)),
                pl.BlockSpec((1, d_pad), lambda i, k: (0, 0)),
            ],
            out_specs=pl.BlockSpec((tm, d_pad), lambda i, k: (i, 0)),
            scratch_shapes=[pltpu.VMEM((tm, d_pad), jnp.float32)],
        )
        dims = ("parallel", "arbitrary")

    out2d = pl.pallas_call(
        kernel,
        out_shape=jax.ShapeDtypeStruct((m_pad, d_pad), out_dtype),
        grid_spec=grid_spec,
        compiler_params=pltpu.CompilerParams(
            dimension_semantics=dims,
            vmem_limit_bytes=vmem_limit),
        cost_estimate=cost,
    )(patches, w2d, b2d)

    if m_pad != M or d_pad != D:
        out2d = out2d[:M, :D]
    out = out2d.reshape(B, N, D)
    if not flatten:
        # PyTorch conv output layout (B, D, gh, gw)
        out = jnp.transpose(out.reshape(B, gh, gw, D), (0, 3, 1, 2))
    # norm_layer=None -> nn.Identity(), nothing to do.
    return out


# --------------------------------------------------------------------------
# Reference + self-test
# --------------------------------------------------------------------------

def _reference(x, weight, bias, patch_size):
    out = jax.lax.conv_general_dilated(
        x.astype(jnp.float32),
        weight.astype(jnp.float32),
        window_strides=patch_size,
        padding="VALID",
        dimension_numbers=("NCHW", "OIHW", "NCHW"),
    ) + bias.reshape(1, -1, 1, 1)
    B, D, gh, gw = out.shape
    return out.reshape(B, D, gh * gw).transpose(0, 2, 1)


if __name__ == "__main__":
    # Small shapes: img_size=16, patch_size=4, in_chans=4, embed_dim=32, batch=2.
    B, C, H, W = 2, 4, 16, 16
    patch_size = (4, 4)
    embed_dim = 32

    key = jax.random.PRNGKey(0)
    kx, kw, kb = jax.random.split(key, 3)
    x = jax.random.normal(kx, (B, C, H, W), dtype=jnp.float32)
    weight = 0.02 * jax.random.normal(
        kw, (embed_dim, C, patch_size[0], patch_size[1]), dtype=jnp.float32)
    bias = 0.01 * jax.random.normal(kb, (embed_dim,), dtype=jnp.float32)

    gh, gw = H // patch_size[0], W // patch_size[1]
    N = gh * gw
    ref = _reference(x, weight, bias, patch_size)

    # Default fast path: bf16 operands on the MXU, f32 accumulation / output.
    fwd = jax.jit(functools.partial(patch_embed_forward, patch_size=patch_size))
    out = jax.block_until_ready(fwd(x, weight, bias))
    assert out.shape == (B, N, embed_dim) and out.dtype == jnp.float32
    assert jnp.allclose(out, ref, atol=2e-2, rtol=2e-2)

    # f32 operands: tight numerical match to the conv reference.
    fwd_f32 = jax.jit(functools.partial(
        patch_embed_forward, patch_size=patch_size, compute_dtype=jnp.float32))
    out_f32 = jax.block_until_ready(fwd_f32(x, weight, bias))
    assert jnp.allclose(out_f32, ref, atol=1e-4, rtol=1e-4)

    # bf16 output (halved writeback).
    fwd_bf16o = jax.jit(functools.partial(
        patch_embed_forward, patch_size=patch_size, out_dtype=jnp.bfloat16))
    out_b = jax.block_until_ready(fwd_bf16o(x, weight, bias))
    assert out_b.dtype == jnp.bfloat16
    assert jnp.allclose(out_b.astype(jnp.float32), ref, atol=3e-2, rtol=3e-2)

    # flatten=False -> PyTorch conv layout (B, D, gh, gw).
    fwd_grid = jax.jit(functools.partial(
        patch_embed_forward, patch_size=patch_size, flatten=False))
    out_grid = jax.block_until_ready(fwd_grid(x, weight, bias))
    assert out_grid.shape == (B, embed_dim, gh, gw)

    print("KERNEL_OK")
</pallas_src>

<mosaic_0001>
module attributes {stable_mosaic.version = 11 : i64} {
  func.func @_proj_kernel_single_k(%arg0: i32, %arg1: memref<16x64xbf16, #tpu.memory_space<vmem>>, %arg2: memref<64x128xbf16, #tpu.memory_space<vmem>>, %arg3: memref<1x128xf32, #tpu.memory_space<vmem>>, %arg4: memref<16x128xf32, #tpu.memory_space<vmem>>) attributes {dimension_semantics = [#tpu.dimension_semantics<parallel>], iteration_bounds = array<i64: 2>, scalar_prefetch = 0 : i64, scratch_operands = 0 : i64, tpu.core_type = #tpu.core_type<tc>, window_params = [{transform_indices = @transform_0, window_bounds = array<i64: 16, 64>}, {pipeline_mode = #tpu.pipeline_mode<synchronous>, transform_indices = @transform_1, window_bounds = array<i64: 64, 128>}, {pipeline_mode = #tpu.pipeline_mode<synchronous>, transform_indices = @transform_2, window_bounds = array<i64: 1, 128>}, {transform_indices = @transform_3, window_bounds = array<i64: 16, 128>}]} {
    %c0 = arith.constant 0 : index
    %c0_0 = arith.constant 0 : index
    %0 = vector.load %arg1[%c0, %c0_0] : memref<16x64xbf16, #tpu.memory_space<vmem>>, vector<16x64xbf16>
    %c0_1 = arith.constant 0 : index
    %c0_2 = arith.constant 0 : index
    %1 = vector.load %arg2[%c0_1, %c0_2] : memref<64x128xbf16, #tpu.memory_space<vmem>>, vector<64x128xbf16>
    %cst = arith.constant dense<0.000000e+00> : vector<16x128xf32>
    %2 = tpu.matmul %0, %1, %cst {dimension_numbers = #tpu.dot_dimension_numbers<[1], [0], [0], [1], [0, 0, 1, 1], [], []>} : vector<16x64xbf16>, vector<64x128xbf16>, vector<16x128xf32> -> vector<16x128xf32>
    %c0_3 = arith.constant 0 : index
    %c0_4 = arith.constant 0 : index
    %3 = vector.load %arg3[%c0_3, %c0_4] : memref<1x128xf32, #tpu.memory_space<vmem>>, vector<1x128xf32>
    %4 = vector.broadcast %3 : vector<1x128xf32> to vector<16x128xf32>
    %5 = arith.addf %2, %4 : vector<16x128xf32>
    %c0_5 = arith.constant 0 : index
    %c0_6 = arith.constant 0 : index
    %6 = vector.load %arg4[%c0_5, %c0_6] : memref<16x128xf32, #tpu.memory_space<vmem>>, vector<16x128xf32>
    tpu.vector_store %arg4[%c0_5, %c0_6], %5 {strides = array<i32>} : memref<16x128xf32, #tpu.memory_space<vmem>>, vector<16x128xf32>,
    return
  }
  func.func @transform_0(%arg0: i32) -> (i32, i32) {
    %c0_i32 = arith.constant 0 : i32
    %c0_i32_0 = arith.constant 0 : i32
    return %arg0, %c0_i32 : i32, i32
  }
  func.func @transform_1(%arg0: i32) -> (i32, i32) {
    %c0_i32 = arith.constant 0 : i32
    %c0_i32_0 = arith.constant 0 : i32
    %c0_i32_1 = arith.constant 0 : i32
    return %c0_i32, %c0_i32_0 : i32, i32
  }
  func.func @transform_2(%arg0: i32) -> (i32, i32) {
    %c0_i32 = arith.constant 0 : i32
    %c0_i32_0 = arith.constant 0 : i32
    %c0_i32_1 = arith.constant 0 : i32
    return %c0_i32, %c0_i32_0 : i32, i32
  }
  func.func @transform_3(%arg0: i32) -> (i32, i32) {
    %c0_i32 = arith.constant 0 : i32
    %c0_i32_0 = arith.constant 0 : i32
    return %arg0, %c0_i32 : i32, i32
  }
}

</mosaic_0001>

<bundles_post_ra>
// kernel: patch_embed_forward.1
= control target key start
LH: loop header
LB: loop body
LE: loop exit
PB: predicated region body
PF: predicated region fallthrough
CT: control target
= control target key end

     0   :  { %8 = vsyncpa [#allocation3], 0  ;;  %s633_s0 = inlined_call_operand.vmem [shape: bf16[32,64], index: 0, kind: input, shape index: {}]   ;;  %s634_s1 = inlined_call_operand.vmem [shape: bf16[64,128], index: 1, kind: input, shape index: {}]   ;;  %s635_s2 = inlined_call_operand.vmem [shape: f32[1,128], index: 2, kind: input, shape index: {}]   ;;  %s636_s3 = inlined_call_operand.hbm [shape: f32[32,128], index: 3, kind: output, shape index: {}]  }
   0x1   :  { %10 = vsyncpa [#allocation3 + $0x1], 0  ;;  %s516_s12 = smov 0   ;;  %s518_s13 = smov 0  }
   0x2   :  { %s520_s14 = smov 0   ;;  %s522_s15 = smov 0  }
   0x3 LB: > { %s537_s16 = sadd.s32 4294967295, %s489_s15   ;;  %s342_s17 = sadd.s32 4294967294, %s489_s15   ;;  %s489_s15 = sphi %s522_s15, %s642_s15   ;;  %s485_s14 = sphi %s520_s14, %s641_s14   ;;  %s481_s13 = sphi %s518_s13, %s640_s13   ;;  %s477_s12 = sphi %s516_s12, %s639_s12  }
   0x4   : > { %s541_s18 = sadd.s32 1, %s489_s15   ;;  %s91_s19 = sadd.s32 1, %s485_s14 }
   0x5   : > { %s88_s20 = ssub.s32 %s489_s15, %s541_s18  ;;  %p101_p0 = scmp.ne.s32.totalorder %s485_s14, %s481_s13 }
   0x6   : > { %p89_p1 = scmp.eq.s32.totalorder %s88_s20, 0  ;;  %p102_p2 = scmp.eq.s32.totalorder %s537_s16, 1 }
   0x7   : > { %p107_p3 = scmp.ne.s32.totalorder %s481_s13, %s477_s12  ;;  %p108_p4 = scmp.eq.s32.totalorder %s342_s17, 1 }
   0x8   : > { %s552_s21 = scalar_select %p89_p1, %s485_s14, %s91_s19  }
   0x9   : > { %p554_p5 = por %p102_p2, %p101_p0  ;;  %p558_p6 = por %p108_p4, %p107_p3 }
   0xa   : > { %p345_p7 = scmp.ge.s32.totalorder %s489_s15, 1  ;;  %p141_p8 = scmp.lt.s32.totalorder %s489_s15, 3 }
   0xc   : > { %p142_p9 = pnand %p345_p7, %p141_p8 }
   0xd   : > { %v422_v0 = vld [vmem:[%s634_s1] sm:$0xff] (!%p142_p9)   ;;  %v491_v1 = vmov (!%p142_p9), 0.0   ;;  %v423_v2 = vld [vmem:[%s634_s1 + $0x8] sm:$0xff] (!%p142_p9)   ;;  %vm492_vm0 = vmmov (!%p142_p9), 0   ;;  %s347_s28 = sshll.u32 (!%p142_p9), %s537_s16, 1  ;;  %v424_v3 = vld [vmem:[%s634_s1 + $0x10] sm:$0xff] (!%p142_p9)  }
   0xe   : > { %145 = sbr.rel (%p142_p9) target bundleno = 261 (0x105), region = 32  ;;  %367 = vmatprep.subr.bf16.mxu0 (!%p142_p9), %v491_v1  ;;  %375 = vmatprep.mubr.msk.bf16.mxu0 (!%p142_p9), %vm492_vm0, %v491_v1  ;;  %p166_p10 = scmp.lt.s32.totalorder (!%p142_p9), %s347_s28, 3  ;;  %v425_v4 = vld [vmem:[%s634_s1 + $0x18] sm:$0xff] (!%p142_p9)   ;;  %vm219_vm1 = vcmask (!%p142_p9), 523264   ;;  %v349_v6 = vld [vmem:[%s635_s2] ss:$0 sm:$0xff] (!%p142_p9) }
   0xf   : > { %368 = vmatpush3.bf16.msra.mxu0 (!%p142_p9), %v422_v0  ;;  %s162_s10 = sand.u32 (!%p142_p9), 1, %s481_s13   ;;  %s361_s25 = sshll.u32 (!%p142_p9), %s537_s16, 8 }
  0x10   : > { %369 = vmatprep.subr.bf16.mxu0 (!%p142_p9), %v491_v1  ;;  %s346_s11 = sshll.u32 (!%p142_p9), %s162_s10, 4  ;;  %s592_s29 = scalar_lea.sflag (!%p142_p9), [#allocation3], %s162_s10 }
  0x11   : > { %s164_s20 = scalar_lea.vmem (!%p142_p9), [#allocation2], %s346_s11  ;;  %s493_s30 = smov (!%p142_p9), [#allocation2]  }
  0x12   : > { %s280_s24 = sshll.u32 (!%p142_p9), %s164_s20, 4  ;;  %s585_s24 = int_to_ptr.vmem [resolvable:$true] %s280_s24 }
  0x13   : > { %370 = vmatpush3.bf16.msra.mxu0 (!%p142_p9), %v423_v2  ;;  %s427_s16 = scalar_lea.vmem (!%p142_p9), %s585_s24, 256 }
  0x14   : > { %371 = vmatprep.subr.bf16.mxu0 (!%p142_p9), %v491_v1  ;;  %p428_p11 = scmp.ne.s32.totalorder (!%p142_p9), %s585_s24, %s427_s16 }
  0x15   : > { %s644_s28 = smov (!%p166_p10, %s347_s28), 3 }
  0x16   : > { %s348_s4 = sshll.u32 %s644_s28, 2  ;;  %s590_s28 = scalar_lea.hbm %s636_s3, %s361_s25 }
  0x17   : > { %s169_s7 = scalar_lea.vmem %s633_s0, %s348_s4  ;;  %372 = vmatpush3.bf16.msra.mxu0 %v424_v3  ;;  %p429_p12 = pnand %p428_p11, %p554_p5 }
  0x18   : > { %373 = vmatprep.subr.bf16.mxu0 %v491_v1  ;;  %v426_v5 = vld [vmem:[%s169_s7] sm:$0xff]   ;;  %s431_s4 = sshll.u32 %s493_s30, 4  ;;  %s432_s4 = int_to_ptr.vmem [resolvable:$false] %s431_s4 }
  0x19   : > { %p430_p13 = pneg %p429_p12  ;;  %s433_s5 = scalar_lea.vmem %s432_s4, 512 }
  0x1a   : > { %p434_p0 = scmp.lt.s32.totalorder %s585_s24, %s432_s4  ;;  %p435_p1 = scmp.lt.s32.totalorder %s433_s5, %s427_s16 }
  0x1b   : > { %374 = vmatpush3.bf16.msra.mxu0 %v425_v4 }
  0x1c   : > { %p436_p2 = por %p435_p1, %p434_p0 }
  0x1e   : > { %376 = vmatmul.mubr.msk.bf16.vlgmr.msra.gmra.mrb[0].mxu0 %vm219_vm1, %v426_v5  ;;  %p437_p3 = pnand %p436_p2, %p430_p13 }
  0xf1   : > { %v257_v7 = vpop.f32.mrb[0].mxu0 }
  0xf2   : > { %v258_v8 = vadd.f32 %v349_v6, %v257_v7  ;;  %v377_v9 = vpop.f32.mrb[1].mxu0 }
  0xf3   : > { %v260_v10 = vpop.f32.mrb[2].mxu0 }
  0xf4   : > { %264 = vst [vmem:[%s164_s20] sm:$0xff] %v258_v8  ;;  %v261_v11 = vadd.f32 %v349_v6, %v260_v10  ;;  %v378_v12 = vpop.f32.mrb[3].mxu0 }
  0xf6   : > { %265 = vst [vmem:[%s164_s20 + $0x8] sm:$0xff] %v261_v11 }
  0xf7   : > { %440 = shalt.err (!%p437_p3)
}
  0xf8   : > { %s441_s6 = scalar_lea.hbm %s590_s28, 256  ;;  %s445_s9 = scalar_lea.hbm %s636_s3, 512 }
  0xf9   : > { %p442_p4 = scmp.ne.s32.totalorder %s590_s28, %s441_s6  ;;  %p446_p9 = scmp.lt.u32.totalorder %s590_s28, %s636_s3 }
  0xfa   : > { %p447_p10 = scmp.lt.u32.totalorder %s445_s9, %s441_s6  ;;  %p449_p12 = scmp.lt.u32.totalorder %s441_s6, %s590_s28 }
  0xfb   : > { %p443_p7 = pnand %p442_p4, %p554_p5 }
  0xfc   : > { %p448_p11 = por %p447_p10, %p446_p9 }
  0xfd   : > { %p444_p8 = pneg %p443_p7 }
  0xfe   : > { %p450_p13 = por %p449_p12, %p448_p11 }
 0x100   : > { %p451_p0 = pnand %p450_p13, %p444_p8 }
 0x102   : > { %454 = shalt.err (!%p451_p0)
}
 0x103   : > { %s494_s17 = smov 128   ;;  %s495_s19 = smov 8  }
 0x104   : > { %379 = dma.vmem_to_hbm [thread:$0]  (%p554_p5), %s585_s24, 256, %s590_s28, %s592_s29, %s494_s17, %s494_s17, %s495_s19  }
 0x105 PF: > { %p385_p1 = scmp.ge.s32.totalorder %s489_s15, 2  ;;  %s295_s20 = sand.u32 1, %s477_s12  }
 0x106   : > { %s296_s25 = scalar_lea.sflag [#allocation3], %s295_s20 }
 0x107   : > { %p382_p2 = pnand %p385_p1, %p558_p6 }
 0x109   : > { %472 = dma.done.wait (!%p382_p2), %s296_s25, 256  }
 0x10a   : > { %474 = vsyncadd (!%p382_p2), %s296_s25, 4294967040  ;;  %p13_p3 = scmp.ge.s32.totalorder %s541_s18, 4   ;;  %s639_s12 = smov %s481_s13 }
 0x10b   : > { %s640_s13 = smov %s485_s14  ;;  %s641_s14 = smov %s552_s21 }
 0x10c   : > { %s642_s15 = smov %s541_s18  ;;  %15 = sbr.rel (!%p13_p3) target bundleno = 3 (0x3), region = 67 }
 0x113   :  { %301 = vsyncpa [#allocation3], 1 }
 0x114   :  { %303 = vsyncpa [#allocation3 + $0x1], 1 }

</bundles_post_ra>
